<compile_context>
chip_gen: v7x
topology: tpu7x:2x2x1
jax: 0.10.0
libtpu: 0.0.40
codegen_flags: <defaults>
</compile_context>

<pallas_src>
import functools
import math

import numpy as np
import jax
import jax.numpy as jnp
from jax import lax
from jax.experimental import pallas as pl
from jax.experimental.pallas import tpu as pltpu

# ---------------- config (small shapes consistent with the module) -------------
N = 2            # batch
C_IN = 4         # in_channels
C_OUT = 8        # out_channels
C_INTER = 4      # inter_channels
S = 2            # num_subset
T = 8            # num_frame
V = 16           # num_node
SLOPE = 0.1      # LeakyReLU negative slope
EPS = 1e-5       # BatchNorm eps

CT = C_IN * T        # 32  rows of x in (c*T + t, v) layout
CIT = C_INTER * T    # 32  rows per q/k subset
OT = C_OUT * T       # 64  rows of the output


# ---------------- fused Pallas kernel -------------------------------------------
def st_block_kernel(x_ref, pe_ref, w_qk_ref, b_qk_ref, alpha_ref, att0_ref,
                    w2y_ref, w2x_ref, b2_ref, w3y_ref, w3x_ref, b3_ref,
                    w4_ref, b4_ref, o_ref, *, num_subset, cit, scale, slope):
    f32 = jnp.float32
    x = x_ref[...]                                       # (C_IN*T, V)
    y = x + pe_ref[...]                                  # spatial positional encoding

    # in_nets 1x1 conv (weights pre-expanded to kron(W, I_T); bias row-repeated)
    qk = jnp.dot(w_qk_ref[...], y, preferred_element_type=f32) + b_qk_ref[...]

    # out_nets + downs1(x) accumulate; start from the downs1 branch
    acc = jnp.dot(w2x_ref[...], x, preferred_element_type=f32)    # (C_OUT*T, V)

    for s in range(num_subset):                          # S is tiny -> unrolled
        qs = qk[s * cit:(s + 1) * cit] * scale           # scale folded into q
        ks = qk[num_subset * cit + s * cit: num_subset * cit + (s + 1) * cit]
        # scores[u, v] = sum_{c,t} q[c,t,u] * k[c,t,v]   ('nsctu,nsctv->nsuv')
        scores = lax.dot_general(qs, ks, (((0,), (0,)), ((), ())),
                                 preferred_element_type=f32)       # (V, V)
        att = jnp.tanh(scores) * alpha_ref[s] + att0_ref[s]
        # y1[c,t,v] = sum_u x[c,t,u] * att[u,v]          ('nctu,nsuv->nsctv')
        y1_s = jnp.dot(x, att, preferred_element_type=f32)         # (C_IN*T, V)
        acc = acc + jnp.dot(w2y_ref[s], y1_s, preferred_element_type=f32)

    y2 = acc + b2_ref[...]
    y2 = jnp.maximum(y2, slope * y2)                     # LeakyReLU(0.1)

    # ff_nets + downs2(x)
    y3 = (jnp.dot(w3y_ref[...], y2, preferred_element_type=f32)
          + jnp.dot(w3x_ref[...], x, preferred_element_type=f32)
          + b3_ref[...])
    y3 = jnp.maximum(y3, slope * y3)

    # out_nett (3,1) temporal conv + downt2, pre-folded into one banded matmul
    z = jnp.dot(w4_ref[...], y3, preferred_element_type=f32) + b4_ref[...]
    z = jnp.maximum(z, slope * z)
    o_ref[...] = z.astype(o_ref.dtype)


# ---------------- pallas_call wrapper --------------------------------------------
def st_attention_block_forward(x, p):
    n, c, t, v = x.shape
    ops = p['packed']
    x_ctv = x.reshape(n, c * t, v)                       # free metadata reshape

    kern = functools.partial(st_block_kernel, num_subset=S, cit=CIT,
                             scale=1.0 / (C_INTER * t), slope=SLOPE)
    z = pl.pallas_call(
        kern,
        out_shape=jax.ShapeDtypeStruct((n, OT, v), jnp.float32),
        grid=(n,),
        in_specs=[
            pl.BlockSpec((None, CT, V), lambda i: (i, 0, 0)),       # x (per batch)
            pl.BlockSpec((CT, V), lambda i: (0, 0)),                # pe
            pl.BlockSpec((2 * S * CIT, CT), lambda i: (0, 0)),      # w_qk
            pl.BlockSpec((2 * S * CIT, 1), lambda i: (0, 0)),       # b_qk
            pl.BlockSpec((S, 1, 1), lambda i: (0, 0, 0)),           # alphas
            pl.BlockSpec((S, V, V), lambda i: (0, 0, 0)),           # att0
            pl.BlockSpec((S, OT, CT), lambda i: (0, 0, 0)),         # w2y (out_nets)
            pl.BlockSpec((OT, CT), lambda i: (0, 0)),               # w2x (downs1)
            pl.BlockSpec((OT, 1), lambda i: (0, 0)),                # b2
            pl.BlockSpec((OT, OT), lambda i: (0, 0)),               # w3y (ff_nets)
            pl.BlockSpec((OT, CT), lambda i: (0, 0)),               # w3x (downs2)
            pl.BlockSpec((OT, 1), lambda i: (0, 0)),                # b3
            pl.BlockSpec((OT, OT), lambda i: (0, 0)),               # w4 (out_nett+downt2)
            pl.BlockSpec((OT, 1), lambda i: (0, 0)),                # b4
        ],
        out_specs=pl.BlockSpec((None, OT, V), lambda i: (i, 0, 0)),
        compiler_params=pltpu.CompilerParams(
            dimension_semantics=("parallel",)),
    )(x_ctv, ops['pe'], ops['w_qk'], ops['b_qk'], ops['alphas'], ops['att0'],
      ops['w2y'], ops['w2x'], ops['b2'], ops['w3y'], ops['w3x'], ops['b3'],
      ops['w4'], ops['b4'])
    return z.reshape(n, C_OUT, t, v)                     # free metadata reshape


# ---------------- host-side operand packing (done once) ---------------------------
def pack_kernel_operands(p):
    eye_t = jnp.eye(T, dtype=jnp.float32)
    kron = lambda w: jnp.kron(w, eye_t)                  # 1x1 conv -> (c*T+t,v) layout
    rep = lambda b: jnp.repeat(b, T)[:, None]            # per-channel bias -> per-row

    ops = {}
    ops['pe'] = p['pe'][0].reshape(CT, V)
    ops['alphas'] = p['alphas']
    ops['att0'] = p['att0']
    ops['w_qk'] = kron(p['w_in'])                        # (2*S*Ci*T, C_IN*T)
    ops['b_qk'] = rep(p['b_in'])
    w2y_full = kron(p['w_out'])                          # (C_OUT*T, S*C_IN*T)
    ops['w2y'] = jnp.stack([w2y_full[:, s * CT:(s + 1) * CT] for s in range(S)])
    ops['w2x'] = kron(p['w_d1'])
    ops['b2'] = rep(p['b_out'] + p['b_d1'])              # residual bias pre-summed
    ops['w3y'] = kron(p['w_ff'])
    ops['w3x'] = kron(p['w_d2'])
    ops['b3'] = rep(p['b_ff'] + p['b_d2'])
    # (3,1) temporal conv: banded block matrix  W[(o,t),(c,t')] = wt[o,c,t'-t+1]
    wt = p['wt_f_ref']                                   # (C_OUT, C_OUT, 3), BN folded
    w_temp = sum(jnp.kron(wt[:, :, k], jnp.eye(T, k=k - 1, dtype=jnp.float32))
                 for k in range(3))
    ops['w4'] = w_temp + kron(p['w_dt2'])                # + downt2 folded in
    ops['b4'] = rep(p['b_t'] + p['b_dt2'])
    return ops


# ---------------- parameters (deterministic, synthetic) -------------------------
def fold_bn(w, b, bn_params):
    gamma, beta, mean, var = bn_params
    sc = gamma / jnp.sqrt(var + EPS)
    return w * sc[:, None], (b - mean) * sc + beta


def make_params(key):
    ks = jax.random.split(key, 20)

    def nrm(k, shape, scale=0.2):
        return scale * jax.random.normal(k, shape, jnp.float32)

    def bn(k, c):
        k1, k2, k3, k4 = jax.random.split(k, 4)
        gamma = 1.0 + 0.1 * jax.random.normal(k1, (c,), jnp.float32)
        beta = 0.1 * jax.random.normal(k2, (c,), jnp.float32)
        mean = 0.1 * jax.random.normal(k3, (c,), jnp.float32)
        var = 1.0 + 0.1 * jax.nn.softplus(jax.random.normal(k4, (c,), jnp.float32))
        return gamma, beta, mean, var

    p = {}

    # PositionalEncoding(in_channels, num_node, num_frame, 'spatial') buffer pe: (1, C, T, V)
    pos = np.tile(np.arange(V), T).astype(np.float32)[:, None]
    div = np.exp(np.arange(0, C_IN, 2).astype(np.float32) * -(math.log(10000.0) / C_IN))
    pe = np.zeros((T * V, C_IN), np.float32)
    pe[:, 0::2] = np.sin(pos * div)
    pe[:, 1::2] = np.cos(pos * div)
    p['pe'] = jnp.asarray(pe.reshape(T, V, C_IN).transpose(2, 0, 1)[None])

    # attention parameters / buffers ('atts' buffer is zeros -> folded away)
    p['alphas'] = jnp.ones((S, 1, 1), jnp.float32)        # nn.Parameter ones(1,S,1,1)
    p['att0'] = jnp.ones((S, V, V), jnp.float32) / V      # attention0s = ones/num_node

    # in_nets: Conv2d(C_IN, 2*S*C_INTER, 1)  (no BN)
    p['w_in'] = nrm(ks[0], (2 * S * C_INTER, C_IN))
    p['b_in'] = nrm(ks[1], (2 * S * C_INTER,))

    # out_nets, ff_nets, downs1, downs2, downt2: 1x1 conv + BN (eval) folded
    w, b = nrm(ks[2], (C_OUT, S * C_IN)), nrm(ks[3], (C_OUT,))
    p['w_out'], p['b_out'] = fold_bn(w, b, bn(ks[4], C_OUT))
    w, b = nrm(ks[5], (C_OUT, C_OUT)), nrm(ks[6], (C_OUT,))
    p['w_ff'], p['b_ff'] = fold_bn(w, b, bn(ks[7], C_OUT))
    w, b = nrm(ks[8], (C_OUT, C_IN)), nrm(ks[9], (C_OUT,))
    p['w_d1'], p['b_d1'] = fold_bn(w, b, bn(ks[10], C_OUT))
    w, b = nrm(ks[11], (C_OUT, C_IN)), nrm(ks[12], (C_OUT,))
    p['w_d2'], p['b_d2'] = fold_bn(w, b, bn(ks[13], C_OUT))
    w, b = nrm(ks[14], (C_OUT, C_OUT)), nrm(ks[15], (C_OUT,))
    p['w_dt2'], p['b_dt2'] = fold_bn(w, b, bn(ks[16], C_OUT))

    # out_nett: Conv2d(C_OUT, C_OUT, (3,1), padding=(1,0)) + BN, folded
    wt, bt = nrm(ks[17], (C_OUT, C_OUT, 3)), nrm(ks[18], (C_OUT,))
    gamma, beta, mean, var = bn(ks[19], C_OUT)
    sc = gamma / jnp.sqrt(var + EPS)
    p['wt_f_ref'] = wt * sc[:, None, None]                # folded taps (Cout, Cin, 3)
    p['b_t'] = (bt - mean) * sc + beta

    # pre-packed kernel operands (kron-expanded weights, row-repeated biases)
    p['packed'] = pack_kernel_operands(p)
    return p


# ---------------- pure-JAX reference (for correctness check) ---------------------
def ref_forward(x, p):
    n, c, t, v = x.shape
    lrelu = lambda a: jnp.maximum(a, SLOPE * a)
    conv = lambda inp, w, b: jnp.einsum('oc,nctv->notv', w, inp) + b[None, :, None, None]
    y = x + p['pe'][:, :, :t]
    qk = conv(y, p['w_in'], p['b_in']).reshape(n, 2, S, C_INTER, t, v)
    q, k = qk[:, 0], qk[:, 1]
    att = jnp.tanh(jnp.einsum('nsctu,nsctv->nsuv', q, k) / (C_INTER * t)) * p['alphas'][None]
    att = att + p['att0'][None]
    y = jnp.einsum('nctu,nsuv->nsctv', x, att).reshape(n, S * c, t, v)
    y = conv(y, p['w_out'], p['b_out'])
    y = lrelu(conv(x, p['w_d1'], p['b_d1']) + y)
    y = lrelu(conv(x, p['w_d2'], p['b_d2']) + conv(y, p['w_ff'], p['b_ff']))
    ypad = jnp.pad(y, ((0, 0), (0, 0), (1, 1), (0, 0)))
    z = jnp.zeros((n, C_OUT, t, v), jnp.float32) + p['b_t'][None, :, None, None]
    for kk in range(3):
        z = z + jnp.einsum('oc,nctv->notv', p['wt_f_ref'][:, :, kk], ypad[:, :, kk:kk + t])
    z = lrelu(conv(y, p['w_dt2'], p['b_dt2']) + z)
    return z


# ---------------- main ------------------------------------------------------------
if __name__ == "__main__":
    key = jax.random.PRNGKey(0)
    kx, kp = jax.random.split(key)
    x = jax.random.normal(kx, (N, C_IN, T, V), jnp.float32)
    params = make_params(kp)

    out = st_attention_block_forward(x, params)
    out = jax.block_until_ready(out)

    ref = ref_forward(x, params)
    assert out.shape == (N, C_OUT, T, V)
    assert bool(jnp.all(jnp.isfinite(out)))
    assert bool(jnp.allclose(out, ref, atol=2e-3, rtol=2e-3)), \
        float(jnp.max(jnp.abs(out - ref)))

    print("KERNEL_OK")
</pallas_src>

<mosaic_0001>
module attributes {stable_mosaic.version = 11 : i64} {
  func.func @st_block_kernel(%arg0: i32, %arg1: memref<1x32x16xf32, #tpu.memory_space<vmem>>, %arg2: memref<32x16xf32, #tpu.memory_space<vmem>>, %arg3: memref<128x32xf32, #tpu.memory_space<vmem>>, %arg4: memref<128x1xf32, #tpu.memory_space<vmem>>, %arg5: memref<2x1x1xf32, #tpu.memory_space<vmem>>, %arg6: memref<2x16x16xf32, #tpu.memory_space<vmem>>, %arg7: memref<2x64x32xf32, #tpu.memory_space<vmem>>, %arg8: memref<64x32xf32, #tpu.memory_space<vmem>>, %arg9: memref<64x1xf32, #tpu.memory_space<vmem>>, %arg10: memref<64x64xf32, #tpu.memory_space<vmem>>, %arg11: memref<64x32xf32, #tpu.memory_space<vmem>>, %arg12: memref<64x1xf32, #tpu.memory_space<vmem>>, %arg13: memref<64x64xf32, #tpu.memory_space<vmem>>, %arg14: memref<64x1xf32, #tpu.memory_space<vmem>>, %arg15: memref<1x64x16xf32, #tpu.memory_space<vmem>>) attributes {dimension_semantics = [#tpu.dimension_semantics<parallel>], iteration_bounds = array<i64: 2>, scalar_prefetch = 0 : i64, scratch_operands = 0 : i64, tpu.core_type = #tpu.core_type<tc>, window_params = [{transform_indices = @transform_0, window_bounds = array<i64: 1, 32, 16>}, {pipeline_mode = #tpu.pipeline_mode<synchronous>, transform_indices = @transform_1, window_bounds = array<i64: 32, 16>}, {pipeline_mode = #tpu.pipeline_mode<synchronous>, transform_indices = @transform_2, window_bounds = array<i64: 128, 32>}, {pipeline_mode = #tpu.pipeline_mode<synchronous>, transform_indices = @transform_3, window_bounds = array<i64: 128, 1>}, {pipeline_mode = #tpu.pipeline_mode<synchronous>, transform_indices = @transform_4, window_bounds = array<i64: 2, 1, 1>}, {pipeline_mode = #tpu.pipeline_mode<synchronous>, transform_indices = @transform_5, window_bounds = array<i64: 2, 16, 16>}, {pipeline_mode = #tpu.pipeline_mode<synchronous>, transform_indices = @transform_6, window_bounds = array<i64: 2, 64, 32>}, {pipeline_mode = #tpu.pipeline_mode<synchronous>, transform_indices = @transform_7, window_bounds = array<i64: 64, 32>}, {pipeline_mode = #tpu.pipeline_mode<synchronous>, transform_indices = @transform_8, window_bounds = array<i64: 64, 1>}, {pipeline_mode = #tpu.pipeline_mode<synchronous>, transform_indices = @transform_9, window_bounds = array<i64: 64, 64>}, {pipeline_mode = #tpu.pipeline_mode<synchronous>, transform_indices = @transform_10, window_bounds = array<i64: 64, 32>}, {pipeline_mode = #tpu.pipeline_mode<synchronous>, transform_indices = @transform_11, window_bounds = array<i64: 64, 1>}, {pipeline_mode = #tpu.pipeline_mode<synchronous>, transform_indices = @transform_12, window_bounds = array<i64: 64, 64>}, {pipeline_mode = #tpu.pipeline_mode<synchronous>, transform_indices = @transform_13, window_bounds = array<i64: 64, 1>}, {transform_indices = @transform_14, window_bounds = array<i64: 1, 64, 16>}]} {
    %c0 = arith.constant 0 : index
    %c0_0 = arith.constant 0 : index
    %c0_1 = arith.constant 0 : index
    %0 = vector.load %arg1[%c0, %c0_0, %c0_1] : memref<1x32x16xf32, #tpu.memory_space<vmem>>, vector<1x32x16xf32>
    %1 = vector.shape_cast %0 : vector<1x32x16xf32> to vector<32x16xf32>
    %c0_2 = arith.constant 0 : index
    %c0_3 = arith.constant 0 : index
    %2 = vector.load %arg2[%c0_2, %c0_3] : memref<32x16xf32, #tpu.memory_space<vmem>>, vector<32x16xf32>
    %3 = arith.addf %1, %2 : vector<32x16xf32>
    %c0_4 = arith.constant 0 : index
    %c0_5 = arith.constant 0 : index
    %4 = vector.load %arg3[%c0_4, %c0_5] : memref<128x32xf32, #tpu.memory_space<vmem>>, vector<128x32xf32>
    %cst = arith.constant dense<0.000000e+00> : vector<128x16xf32>
    %5 = tpu.matmul %4, %3, %cst {dimension_numbers = #tpu.dot_dimension_numbers<[1], [0], [0], [1], [0, 0, 1, 1], [], []>} : vector<128x32xf32>, vector<32x16xf32>, vector<128x16xf32> -> vector<128x16xf32>
    %c0_6 = arith.constant 0 : index
    %c0_7 = arith.constant 0 : index
    %6 = vector.load %arg4[%c0_6, %c0_7] : memref<128x1xf32, #tpu.memory_space<vmem>>, vector<128x1xf32>
    %7 = vector.broadcast %6 : vector<128x1xf32> to vector<128x16xf32>
    %8 = arith.addf %5, %7 : vector<128x16xf32>
    %c0_8 = arith.constant 0 : index
    %c0_9 = arith.constant 0 : index
    %9 = vector.load %arg8[%c0_8, %c0_9] : memref<64x32xf32, #tpu.memory_space<vmem>>, vector<64x32xf32>
    %cst_10 = arith.constant dense<0.000000e+00> : vector<64x16xf32>
    %10 = tpu.matmul %9, %1, %cst_10 {dimension_numbers = #tpu.dot_dimension_numbers<[1], [0], [0], [1], [0, 0, 1, 1], [], []>} : vector<64x32xf32>, vector<32x16xf32>, vector<64x16xf32> -> vector<64x16xf32>
    %11 = vector.extract_strided_slice %8 {offsets = [0, 0], sizes = [32, 16], strides = [1, 1]} : vector<128x16xf32> to vector<32x16xf32>
    %cst_11 = arith.constant 3.125000e-02 : f32
    %12 = vector.broadcast %cst_11 : f32 to vector<32x16xf32>
    %13 = arith.mulf %11, %12 : vector<32x16xf32>
    %14 = vector.extract_strided_slice %8 {offsets = [64, 0], sizes = [32, 16], strides = [1, 1]} : vector<128x16xf32> to vector<32x16xf32>
    %cst_12 = arith.constant dense<0.000000e+00> : vector<16x16xf32>
    %15 = tpu.matmul %13, %14, %cst_12 {dimension_numbers = #tpu.dot_dimension_numbers<[0], [0], [1], [1], [0, 1, 1, 1], [], []>} : vector<32x16xf32>, vector<32x16xf32>, vector<16x16xf32> -> vector<16x16xf32>
    %16 = math.tanh %15 : vector<16x16xf32>
    %c0_13 = arith.constant 0 : index
    %c0_14 = arith.constant 0 : index
    %c0_15 = arith.constant 0 : index
    %17 = vector.load %arg5[%c0_13, %c0_14, %c0_15] : memref<2x1x1xf32, #tpu.memory_space<vmem>>, vector<1x1x1xf32>
    %18 = vector.shape_cast %17 : vector<1x1x1xf32> to vector<1x1xf32>
    %19 = vector.broadcast %18 : vector<1x1xf32> to vector<16x16xf32>
    %20 = arith.mulf %16, %19 : vector<16x16xf32>
    %c0_16 = arith.constant 0 : index
    %c0_17 = arith.constant 0 : index
    %c0_18 = arith.constant 0 : index
    %21 = vector.load %arg6[%c0_16, %c0_17, %c0_18] : memref<2x16x16xf32, #tpu.memory_space<vmem>>, vector<1x16x16xf32>
    %22 = vector.shape_cast %21 : vector<1x16x16xf32> to vector<16x16xf32>
    %23 = arith.addf %20, %22 : vector<16x16xf32>
    %cst_19 = arith.constant dense<0.000000e+00> : vector<32x16xf32>
    %24 = tpu.matmul %1, %23, %cst_19 {dimension_numbers = #tpu.dot_dimension_numbers<[1], [0], [0], [1], [0, 0, 1, 1], [], []>} : vector<32x16xf32>, vector<16x16xf32>, vector<32x16xf32> -> vector<32x16xf32>
    %c0_20 = arith.constant 0 : index
    %c0_21 = arith.constant 0 : index
    %c0_22 = arith.constant 0 : index
    %25 = vector.load %arg7[%c0_20, %c0_21, %c0_22] : memref<2x64x32xf32, #tpu.memory_space<vmem>>, vector<1x64x32xf32>
    %26 = vector.shape_cast %25 : vector<1x64x32xf32> to vector<64x32xf32>
    %cst_23 = arith.constant dense<0.000000e+00> : vector<64x16xf32>
    %27 = tpu.matmul %26, %24, %cst_23 {dimension_numbers = #tpu.dot_dimension_numbers<[1], [0], [0], [1], [0, 0, 1, 1], [], []>} : vector<64x32xf32>, vector<32x16xf32>, vector<64x16xf32> -> vector<64x16xf32>
    %28 = arith.addf %10, %27 : vector<64x16xf32>
    %29 = vector.extract_strided_slice %8 {offsets = [32, 0], sizes = [32, 16], strides = [1, 1]} : vector<128x16xf32> to vector<32x16xf32>
    %cst_24 = arith.constant 3.125000e-02 : f32
    %30 = vector.broadcast %cst_24 : f32 to vector<32x16xf32>
    %31 = arith.mulf %29, %30 : vector<32x16xf32>
    %32 = vector.extract_strided_slice %8 {offsets = [96, 0], sizes = [32, 16], strides = [1, 1]} : vector<128x16xf32> to vector<32x16xf32>
    %cst_25 = arith.constant dense<0.000000e+00> : vector<16x16xf32>
    %33 = tpu.matmul %31, %32, %cst_25 {dimension_numbers = #tpu.dot_dimension_numbers<[0], [0], [1], [1], [0, 1, 1, 1], [], []>} : vector<32x16xf32>, vector<32x16xf32>, vector<16x16xf32> -> vector<16x16xf32>
    %34 = math.tanh %33 : vector<16x16xf32>
    %c1 = arith.constant 1 : index
    %c0_26 = arith.constant 0 : index
    %c0_27 = arith.constant 0 : index
    %35 = vector.load %arg5[%c1, %c0_26, %c0_27] : memref<2x1x1xf32, #tpu.memory_space<vmem>>, vector<1x1x1xf32>
    %36 = vector.shape_cast %35 : vector<1x1x1xf32> to vector<1x1xf32>
    %37 = vector.broadcast %36 : vector<1x1xf32> to vector<16x16xf32>
    %38 = arith.mulf %34, %37 : vector<16x16xf32>
    %c1_28 = arith.constant 1 : index
    %c0_29 = arith.constant 0 : index
    %c0_30 = arith.constant 0 : index
    %39 = vector.load %arg6[%c1_28, %c0_29, %c0_30] : memref<2x16x16xf32, #tpu.memory_space<vmem>>, vector<1x16x16xf32>
    %40 = vector.shape_cast %39 : vector<1x16x16xf32> to vector<16x16xf32>
    %41 = arith.addf %38, %40 : vector<16x16xf32>
    %cst_31 = arith.constant dense<0.000000e+00> : vector<32x16xf32>
    %42 = tpu.matmul %1, %41, %cst_31 {dimension_numbers = #tpu.dot_dimension_numbers<[1], [0], [0], [1], [0, 0, 1, 1], [], []>} : vector<32x16xf32>, vector<16x16xf32>, vector<32x16xf32> -> vector<32x16xf32>
    %c1_32 = arith.constant 1 : index
    %c0_33 = arith.constant 0 : index
    %c0_34 = arith.constant 0 : index
    %43 = vector.load %arg7[%c1_32, %c0_33, %c0_34] : memref<2x64x32xf32, #tpu.memory_space<vmem>>, vector<1x64x32xf32>
    %44 = vector.shape_cast %43 : vector<1x64x32xf32> to vector<64x32xf32>
    %cst_35 = arith.constant dense<0.000000e+00> : vector<64x16xf32>
    %45 = tpu.matmul %44, %42, %cst_35 {dimension_numbers = #tpu.dot_dimension_numbers<[1], [0], [0], [1], [0, 0, 1, 1], [], []>} : vector<64x32xf32>, vector<32x16xf32>, vector<64x16xf32> -> vector<64x16xf32>
    %46 = arith.addf %28, %45 : vector<64x16xf32>
    %c0_36 = arith.constant 0 : index
    %c0_37 = arith.constant 0 : index
    %47 = vector.load %arg9[%c0_36, %c0_37] : memref<64x1xf32, #tpu.memory_space<vmem>>, vector<64x1xf32>
    %48 = vector.broadcast %47 : vector<64x1xf32> to vector<64x16xf32>
    %49 = arith.addf %46, %48 : vector<64x16xf32>
    %cst_38 = arith.constant 1.000000e-01 : f32
    %50 = vector.broadcast %cst_38 : f32 to vector<64x16xf32>
    %51 = arith.mulf %50, %49 : vector<64x16xf32>
    %52 = arith.maximumf %49, %51 : vector<64x16xf32>
    %c0_39 = arith.constant 0 : index
    %c0_40 = arith.constant 0 : index
    %53 = vector.load %arg10[%c0_39, %c0_40] : memref<64x64xf32, #tpu.memory_space<vmem>>, vector<64x64xf32>
    %cst_41 = arith.constant dense<0.000000e+00> : vector<64x16xf32>
    %54 = tpu.matmul %53, %52, %cst_41 {dimension_numbers = #tpu.dot_dimension_numbers<[1], [0], [0], [1], [0, 0, 1, 1], [], []>} : vector<64x64xf32>, vector<64x16xf32>, vector<64x16xf32> -> vector<64x16xf32>
    %c0_42 = arith.constant 0 : index
    %c0_43 = arith.constant 0 : index
    %55 = vector.load %arg11[%c0_42, %c0_43] : memref<64x32xf32, #tpu.memory_space<vmem>>, vector<64x32xf32>
    %cst_44 = arith.constant dense<0.000000e+00> : vector<64x16xf32>
    %56 = tpu.matmul %55, %1, %cst_44 {dimension_numbers = #tpu.dot_dimension_numbers<[1], [0], [0], [1], [0, 0, 1, 1], [], []>} : vector<64x32xf32>, vector<32x16xf32>, vector<64x16xf32> -> vector<64x16xf32>
    %57 = arith.addf %54, %56 : vector<64x16xf32>
    %c0_45 = arith.constant 0 : index
    %c0_46 = arith.constant 0 : index
    %58 = vector.load %arg12[%c0_45, %c0_46] : memref<64x1xf32, #tpu.memory_space<vmem>>, vector<64x1xf32>
    %59 = vector.broadcast %58 : vector<64x1xf32> to vector<64x16xf32>
    %60 = arith.addf %57, %59 : vector<64x16xf32>
    %cst_47 = arith.constant 1.000000e-01 : f32
    %61 = vector.broadcast %cst_47 : f32 to vector<64x16xf32>
    %62 = arith.mulf %61, %60 : vector<64x16xf32>
    %63 = arith.maximumf %60, %62 : vector<64x16xf32>
    %c0_48 = arith.constant 0 : index
    %c0_49 = arith.constant 0 : index
    %64 = vector.load %arg13[%c0_48, %c0_49] : memref<64x64xf32, #tpu.memory_space<vmem>>, vector<64x64xf32>
    %cst_50 = arith.constant dense<0.000000e+00> : vector<64x16xf32>
    %65 = tpu.matmul %64, %63, %cst_50 {dimension_numbers = #tpu.dot_dimension_numbers<[1], [0], [0], [1], [0, 0, 1, 1], [], []>} : vector<64x64xf32>, vector<64x16xf32>, vector<64x16xf32> -> vector<64x16xf32>
    %c0_51 = arith.constant 0 : index
    %c0_52 = arith.constant 0 : index
    %66 = vector.load %arg14[%c0_51, %c0_52] : memref<64x1xf32, #tpu.memory_space<vmem>>, vector<64x1xf32>
    %67 = vector.broadcast %66 : vector<64x1xf32> to vector<64x16xf32>
    %68 = arith.addf %65, %67 : vector<64x16xf32>
    %cst_53 = arith.constant 1.000000e-01 : f32
    %69 = vector.broadcast %cst_53 : f32 to vector<64x16xf32>
    %70 = arith.mulf %69, %68 : vector<64x16xf32>
    %71 = arith.maximumf %68, %70 : vector<64x16xf32>
    %c0_54 = arith.constant 0 : index
    %c0_55 = arith.constant 0 : index
    %c0_56 = arith.constant 0 : index
    %72 = vector.load %arg15[%c0_54, %c0_55, %c0_56] : memref<1x64x16xf32, #tpu.memory_space<vmem>>, vector<1x64x16xf32>
    %73 = vector.shape_cast %72 : vector<1x64x16xf32> to vector<64x16xf32>
    %74 = vector.shape_cast %71 : vector<64x16xf32> to vector<1x64x16xf32>
    tpu.vector_store %arg15[%c0_54, %c0_55, %c0_56], %74 {strides = array<i32>} : memref<1x64x16xf32, #tpu.memory_space<vmem>>, vector<1x64x16xf32>,
    return
  }
  func.func @transform_0(%arg0: i32) -> (i32, i32, i32) {
    %c0_i32 = arith.constant 0 : i32
    %c0_i32_0 = arith.constant 0 : i32
    %c0_i32_1 = arith.constant 0 : i32
    return %arg0, %c0_i32, %c0_i32_0 : i32, i32, i32
  }
  func.func @transform_1(%arg0: i32) -> (i32, i32) {
    %c0_i32 = arith.constant 0 : i32
    %c0_i32_0 = arith.constant 0 : i32
    %c0_i32_1 = arith.constant 0 : i32
    return %c0_i32, %c0_i32_0 : i32, i32
  }
  func.func @transform_2(%arg0: i32) -> (i32, i32) {
    %c0_i32 = arith.constant 0 : i32
    %c0_i32_0 = arith.constant 0 : i32
    %c0_i32_1 = arith.constant 0 : i32
    return %c0_i32, %c0_i32_0 : i32, i32
  }
  func.func @transform_3(%arg0: i32) -> (i32, i32) {
    %c0_i32 = arith.constant 0 : i32
    %c0_i32_0 = arith.constant 0 : i32
    %c0_i32_1 = arith.constant 0 : i32
    return %c0_i32, %c0_i32_0 : i32, i32
  }
  func.func @transform_4(%arg0: i32) -> (i32, i32, i32) {
    %c0_i32 = arith.constant 0 : i32
    %c0_i32_0 = arith.constant 0 : i32
    %c0_i32_1 = arith.constant 0 : i32
    %c0_i32_2 = arith.constant 0 : i32
    return %c0_i32, %c0_i32_0, %c0_i32_1 : i32, i32, i32
  }
  func.func @transform_5(%arg0: i32) -> (i32, i32, i32) {
    %c0_i32 = arith.constant 0 : i32
    %c0_i32_0 = arith.constant 0 : i32
    %c0_i32_1 = arith.constant 0 : i32
    %c0_i32_2 = arith.constant 0 : i32
    return %c0_i32, %c0_i32_0, %c0_i32_1 : i32, i32, i32
  }
  func.func @transform_6(%arg0: i32) -> (i32, i32, i32) {
    %c0_i32 = arith.constant 0 : i32
    %c0_i32_0 = arith.constant 0 : i32
    %c0_i32_1 = arith.constant 0 : i32
    %c0_i32_2 = arith.constant 0 : i32
    return %c0_i32, %c0_i32_0, %c0_i32_1 : i32, i32, i32
  }
  func.func @transform_7(%arg0: i32) -> (i32, i32) {
    %c0_i32 = arith.constant 0 : i32
    %c0_i32_0 = arith.constant 0 : i32
    %c0_i32_1 = arith.constant 0 : i32
    return %c0_i32, %c0_i32_0 : i32, i32
  }
  func.func @transform_8(%arg0: i32) -> (i32, i32) {
    %c0_i32 = arith.constant 0 : i32
    %c0_i32_0 = arith.constant 0 : i32
    %c0_i32_1 = arith.constant 0 : i32
    return %c0_i32, %c0_i32_0 : i32, i32
  }
  func.func @transform_9(%arg0: i32) -> (i32, i32) {
    %c0_i32 = arith.constant 0 : i32
    %c0_i32_0 = arith.constant 0 : i32
    %c0_i32_1 = arith.constant 0 : i32
    return %c0_i32, %c0_i32_0 : i32, i32
  }
  func.func @transform_10(%arg0: i32) -> (i32, i32) {
    %c0_i32 = arith.constant 0 : i32
    %c0_i32_0 = arith.constant 0 : i32
    %c0_i32_1 = arith.constant 0 : i32
    return %c0_i32, %c0_i32_0 : i32, i32
  }
  func.func @transform_11(%arg0: i32) -> (i32, i32) {
    %c0_i32 = arith.constant 0 : i32
    %c0_i32_0 = arith.constant 0 : i32
    %c0_i32_1 = arith.constant 0 : i32
    return %c0_i32, %c0_i32_0 : i32, i32
  }
  func.func @transform_12(%arg0: i32) -> (i32, i32) {
    %c0_i32 = arith.constant 0 : i32
    %c0_i32_0 = arith.constant 0 : i32
    %c0_i32_1 = arith.constant 0 : i32
    return %c0_i32, %c0_i32_0 : i32, i32
  }
  func.func @transform_13(%arg0: i32) -> (i32, i32) {
    %c0_i32 = arith.constant 0 : i32
    %c0_i32_0 = arith.constant 0 : i32
    %c0_i32_1 = arith.constant 0 : i32
    return %c0_i32, %c0_i32_0 : i32, i32
  }
  func.func @transform_14(%arg0: i32) -> (i32, i32, i32) {
    %c0_i32 = arith.constant 0 : i32
    %c0_i32_0 = arith.constant 0 : i32
    %c0_i32_1 = arith.constant 0 : i32
    return %arg0, %c0_i32, %c0_i32_0 : i32, i32, i32
  }
}

</mosaic_0001>

<bundles_post_ra>
// kernel: tpu_custom_call.1
= control target key start
LH: loop header
LB: loop body
LE: loop exit
PB: predicated region body
PF: predicated region fallthrough
CT: control target
= control target key end

     0   :  { %s3004_s29 = smov 0   ;;  %s3485_s0 = inlined_call_operand.vmem [shape: f32[2,32,16], index: 0, kind: input, shape index: {}]   ;;  %s3486_s1 = inlined_call_operand.vmem [shape: f32[32,16], index: 1, kind: input, shape index: {}]   ;;  %s3487_s2 = inlined_call_operand.vmem [shape: f32[128,32], index: 2, kind: input, shape index: {}]   ;;  %s3488_s3 = inlined_call_operand.vmem [shape: f32[128,1], index: 3, kind: input, shape index: {}]   ;;  %s3489_s4 = inlined_call_operand.vmem [shape: f32[2,1,1], index: 4, kind: input, shape index: {}]   ;;  %s3490_s5 = inlined_call_operand.vmem [shape: f32[2,16,16], index: 5, kind: input, shape index: {}]   ;;  %s3491_s6 = inlined_call_operand.vmem [shape: f32[2,64,32], index: 6, kind: input, shape index: {}]   ;;  %s3492_s7 = inlined_call_operand.vmem [shape: f32[64,32], index: 7, kind: input, shape index: {}]   ;;  %s3493_s8 = inlined_call_operand.vmem [shape: f32[64,1], index: 8, kind: input, shape index: {}]   ;;  %s3494_s9 = inlined_call_operand.vmem [shape: f32[64,64], index: 9, kind: input, shape index: {}]   ;;  %s3495_s10 = inlined_call_operand.vmem [shape: f32[64,32], index: 10, kind: input, shape index: {}]   ;;  %s3496_s11 = inlined_call_operand.vmem [shape: f32[64,1], index: 11, kind: input, shape index: {}]   ;;  %s3497_s12 = inlined_call_operand.vmem [shape: f32[64,64], index: 12, kind: input, shape index: {}]   ;;  %s3498_s13 = inlined_call_operand.vmem [shape: f32[64,1], index: 13, kind: input, shape index: {}]   ;;  %s3499_s14 = inlined_call_operand.vmem [shape: f32[2,64,16], index: 14, kind: output, shape index: {}]  }
   0x1 LB: > { %s2344_s30 = sadd.s32 4294967295, %s2926_s29   ;;  %p2348_p0 = scmp.ge.s32.totalorder %s2926_s29, 1  ;;  %s2926_s29 = sphi %s3004_s29, %s24_s29  }
   0x2   : > { %p412_p1 = scmp.lt.s32.totalorder %s2926_s29, 3 }
   0x4   : > { %p413_p2 = pnand %p2348_p0, %p412_p1 }
   0x5   : > { %p458_p3 = scmp.lt.s32.totalorder (!%p413_p2), %s2344_s30, 1  ;;  %vm592_vm0 = vcmask (!%p413_p2), 261120   ;;  %v480_v0 = vld [vmem:[%s3487_s2] sm:$0xff] (!%p413_p2)  ;;  %v2928_v1 = vmov (!%p413_p2), 0   ;;  %v473_v3 = vld [vmem:[%s3486_s1 + $0x8] sm:$0xff] (!%p413_p2)  ;;  %v474_v4 = vld [vmem:[%s3486_s1 + $0x10] sm:$0xff] (!%p413_p2) }
   0x6   : > { %416 = sbr.rel (%p413_p2) target bundleno = 1574 (0x626), region = 76  ;;  %2910 = vset.pattern.permute.xlu0 (!%p413_p2), %v2928_v1  ;;  %2911 = vset.pattern.permute.xlu1 (!%p413_p2), %v2928_v1  ;;  %v472_v2 = vld [vmem:[%s3486_s1] sm:$0xff] (!%p413_p2)  ;;  %v475_v5 = vld [vmem:[%s3486_s1 + $0x18] sm:$0xff] (!%p413_p2)  ;;  %v498_v15 = vld [vmem:[%s3488_s3 + $0x10] sm:$0xff] (!%p413_p2)  ;;  %vm929_vm1 = vcmask (!%p413_p2), 130048   ;;  %vm1878_vm2 = vcmask (!%p413_p2), 523264  }
   0x7   : > { %2578 = vmatprep.mubr.msk.f32.mxu0 (!%p413_p2), %vm592_vm0, %v480_v0  ;;  %v496_v14 = vld [vmem:[%s3488_s3] sm:$0xff] (!%p413_p2)  ;;  %524 = vperm.xlu1 (!%p413_p2), %2911, %v498_v15   ;;  %v497_v18 = vld [vmem:[%s3488_s3 + $0x8] sm:$0xff] (!%p413_p2)  ;;  %v499_v19 = vld [vmem:[%s3488_s3 + $0x18] sm:$0xff] (!%p413_p2) }
   0x8   : > { %514 = vperm.xlu0 (!%p413_p2), %2910, %v496_v14   ;;  %v500_v20 = vld [vmem:[%s3488_s3 + $0x20] sm:$0xff] (!%p413_p2)  ;;  %v501_v21 = vld [vmem:[%s3488_s3 + $0x28] sm:$0xff] (!%p413_p2)  ;;  %v482_v23 = vld [vmem:[%s3487_s2 + $0x10] sm:$0xff] (!%p413_p2) }
   0x9   : > { %v481_v22 = vld [vmem:[%s3487_s2 + $0x8] sm:$0xff] (!%p413_p2)  ;;  %v504_v24 = vld [vmem:[%s3488_s3 + $0x40] sm:$0xff] (!%p413_p2)  ;;  %v483_v26 = vld [vmem:[%s3487_s2 + $0x18] sm:$0xff] (!%p413_p2) }
   0xa   : > { %v505_v25 = vld [vmem:[%s3488_s3 + $0x48] sm:$0xff] (!%p413_p2)  ;;  %v484_v27 = vld [vmem:[%s3487_s2 + $0x20] sm:$0xff] (!%p413_p2)  ;;  %v502_v28 = vld [vmem:[%s3488_s3 + $0x30] sm:$0xff] (!%p413_p2) }
   0xb   : > { %529 = vperm.xlu1 (!%p413_p2), %2911, %v499_v19   ;;  %v503_v29 = vld [vmem:[%s3488_s3 + $0x38] sm:$0xff] (!%p413_p2)  ;;  %v485_v30 = vld [vmem:[%s3487_s2 + $0x28] sm:$0xff] (!%p413_p2)  ;;  %v486_v31 = vld [vmem:[%s3487_s2 + $0x30] sm:$0xff] (!%p413_p2) }
   0xc   : > { %519 = vperm.xlu0 (!%p413_p2), %2910, %v497_v18   ;;  %v506_v32 = vld [vmem:[%s3488_s3 + $0x50] sm:$0xff] (!%p413_p2)  ;;  %v507_v33 = vld [vmem:[%s3488_s3 + $0x58] sm:$0xff] (!%p413_p2)  ;;  %v488_v35 = vld [vmem:[%s3487_s2 + $0x40] sm:$0xff] (!%p413_p2) }
   0xd   : > { %s3501_s30 = smov (!%p458_p3, %s2344_s30), 1  ;;  %v487_v34 = vld [vmem:[%s3487_s2 + $0x38] sm:$0xff]  ;;  %v508_v36 = vld [vmem:[%s3488_s3 + $0x60] sm:$0xff]  ;;  %v509_v37 = vld [vmem:[%s3488_s3 + $0x68] sm:$0xff] }
   0xe   : > { %s2444_s17 = sshll.u32 %s3501_s30, 5  ;;  %v489_v38 = vld [vmem:[%s3487_s2 + $0x48] sm:$0xff]  ;;  %v490_v39 = vld [vmem:[%s3487_s2 + $0x50] sm:$0xff]  ;;  %v511_v41 = vld [vmem:[%s3488_s3 + $0x78] sm:$0xff]  ;;  %s2445_s23 = sshll.u32 %s3501_s30, 6 }
   0xf   : > { %s462_s26 = scalar_lea.vmem %s3485_s0, %s2444_s17  ;;  %539 = vperm.xlu1 %2911, %v501_v21   ;;  %v510_v40 = vld [vmem:[%s3488_s3 + $0x70] sm:$0xff]  ;;  %v491_v42 = vld [vmem:[%s3487_s2 + $0x58] sm:$0xff]  ;;  %v492_v43 = vld [vmem:[%s3487_s2 + $0x60] sm:$0xff] }
  0x10   : > { %v3034_v6 = vld [vmem:[%s462_s26] sm:$0xff]  ;;  %v3036_v7 = vld [vmem:[%s462_s26 + $0x8] sm:$0xff]  ;;  %v3038_v8 = vld [vmem:[%s462_s26 + $0x10] sm:$0xff]  ;;  %534 = vperm.xlu0 %2910, %v500_v20  }
  0x11   : > { %v476_v9 = vadd.f32 %v472_v2, %v3034_v6  ;;  %v477_v10 = vadd.f32 %v473_v3, %v3036_v7  ;;  %v3042_v11 = vld [vmem:[%s462_s26 + $0x18] sm:$0xff]  ;;  %v478_v12 = vadd.f32 %v474_v4, %v3038_v8  ;;  %v493_v44 = vld [vmem:[%s3487_s2 + $0x68] sm:$0xff]  ;;  %v494_v45 = vld [vmem:[%s3487_s2 + $0x70] sm:$0xff]  ;;  %s3464_s26 = scalar_lea.vmem %s3499_s14, %s2445_s23 }
  0x12   : > { %v479_v13 = vadd.f32 %v475_v5, %v3042_v11  ;;  %v495_v46 = vld [vmem:[%s3487_s2 + $0x78] sm:$0xff] }
  0x13   : > { %v2780_v16 = vpack.c.bf16 %v477_v10, %v476_v9  ;;  %559 = vperm.xlu1 %2911, %v505_v25  }
  0x14   : > { %v2784_v17 = vpack.c.bf16 %v479_v13, %v478_v12  ;;  %554 = vperm.xlu0 %2910, %v504_v24  }
  0x15   : > { %2781 = vmatprep.subr.bf16.mxu0 %v2780_v16 }
  0x16   : > { %2783 = vmatpush3.bf16.msra.mxu0 %v2780_v16 }
  0x17   : > { %2785 = vmatprep.subr.bf16.mxu0 %v2784_v17  ;;  %549 = vperm.xlu1 %2911, %v503_v29  }
  0x18   : > { %544 = vperm.xlu0 %2910, %v502_v28  }
  0x1a   : > { %2787 = vmatpush3.bf16.msra.mxu0 %v2784_v17 }
  0x1b   : > { %569 = vperm.xlu1 %2911, %v507_v33  }
  0x1c   : > { %564 = vperm.xlu0 %2910, %v506_v32  }
  0x1d   : > { %2579 = vmatmul.mubr.msk.f32.vlgmr.msra.gmra.mrb[0].mxu0 %vm592_vm0, %v481_v22 }
  0x1e   : > { %2581 = vmatprep.mubr.msk.f32.mxu0 %vm592_vm0, %v482_v23 }
  0x1f   : > { %579 = vperm.xlu1 %2911, %v509_v37  }
  0x20   : > { %574 = vperm.xlu0 %2910, %v508_v36  }
  0x21   : > { %2582 = vmatmul.mubr.msk.f32.gmra.mrb[2].mxu0 %vm592_vm0, %v483_v26 }
  0x22   : > { %2584 = vmatprep.mubr.msk.f32.mxu0 %vm592_vm0, %v484_v27 }
  0x23   : > { %589 = vperm.xlu1 %2911, %v511_v41  }
  0x24   : > { %584 = vperm.xlu0 %2910, %v510_v40  }
  0x25   : > { %2585 = vmatmul.mubr.msk.f32.gmra.mrb[4].mxu0 %vm592_vm0, %v485_v30 }
  0x26   : > { %2587 = vmatprep.mubr.msk.f32.mxu0 %vm592_vm0, %v486_v31 }
  0x29   : > { %2588 = vmatmul.mubr.msk.f32.gmra.mrb[6].mxu0 %vm592_vm0, %v487_v34 }
  0x2a   : > { %2590 = vmatprep.mubr.msk.f32.mxu0 %vm592_vm0, %v488_v35 }
  0x2d   : > { %2591 = vmatmul.mubr.msk.f32.gmra.mrb[8].mxu0 %vm592_vm0, %v489_v38 }
  0x2e   : > { %2593 = vmatprep.mubr.msk.f32.mxu0 %vm592_vm0, %v490_v39 }
  0x31   : > { %2594 = vmatmul.mubr.msk.f32.gmra.mrb[10].mxu0 %vm592_vm0, %v491_v42 }
  0x32   : > { %2596 = vmatprep.mubr.msk.f32.mxu0 %vm592_vm0, %v492_v43 }
  0x35   : > { %2597 = vmatmul.mubr.msk.f32.gmra.mrb[12].mxu0 %vm592_vm0, %v493_v44 }
  0x36   : > { %2599 = vmatprep.mubr.msk.f32.mxu0 %vm592_vm0, %v494_v45 }
  0x39   : > { %2600 = vmatmul.mubr.msk.f32.gmra.mrb[14].mxu0 %vm592_vm0, %v495_v46 }
  0x86   : > { %v525_v47 = vpop.permute.xlu1 %524 }
  0x87   : > { %v515_v48 = vpop.permute.xlu0 %514 }
  0x8a   : > { %v530_v49 = vpop.permute.xlu1 %529 }
  0x8b   : > { %v520_v50 = vpop.permute.xlu0 %519 }
  0x8e   : > { %v540_v51 = vpop.permute.xlu1 %539 }
  0x8f   : > { %v535_v52 = vpop.permute.xlu0 %534 }
  0x92   : > { %v560_v56 = vpop.permute.xlu1 %559 }
  0x93   : > { %v555_v60 = vpop.permute.xlu0 %554 }
  0x96   : > { %v550_v2 = vpop.permute.xlu1 %549 }
  0x97   : > { %v545_v5 = vpop.permute.xlu0 %544 }
  0x9a   : > { %v570_v15 = vpop.permute.xlu1 %569 }
  0x9b   : > { %v565_v20 = vpop.permute.xlu0 %564 }
  0x9e   : > { %v580_v30 = vpop.permute.xlu1 %579 }
  0x9f   : > { %v575_v32 = vpop.permute.xlu0 %574 }
  0xa2   : > { %v590_v39 = vpop.permute.xlu1 %589 }
  0xa3   : > { %v585_v42 = vpop.permute.xlu0 %584 }
  0xf0   : > { %v2580_v53 = vpop.f32.mrb[0].mxu0 }
  0xf1   : > { %v707_v54 = vpop.f32.mrb[1].mxu0  ;;  %v713_v57 = vadd.f32 %v2580_v53, %v520_v50  ;;  %v1661_v50 = vld [vmem:[%s3493_s8] sm:$0xff]  ;;  %v1666_v53 = vld [vmem:[%s3493_s8 + $0x28] sm:$0xff] }
  0xf2   : > { %v708_v55 = vadd.f32 %v707_v54, %v515_v48  ;;  %v2371_v48 = vld [vmem:[%s3489_s4] ss:$0 sm:$0xff] }
  0xf3   : > { %v795_v63 = vmul.f32 0.03125, %v713_v57  ;;  %v1665_v54 = vld [vmem:[%s3493_s8 + $0x20] sm:$0xff]  ;;  %v2009_v57 = vld [vmem:[%s3496_s11 + $0x8] sm:$0xff] }
  0xf4   : > { %v794_v58 = vmul.f32 0.03125, %v708_v55  ;;  %v2583_v59 = vpop.f32.mrb[2].mxu0  ;;  %v1668_v55 = vld [vmem:[%s3493_s8 + $0x38] sm:$0xff] }
  0xf5   : > { %v717_v61 = vpop.f32.mrb[3].mxu0  ;;  %v723_v9 = vadd.f32 %v2583_v59, %v530_v49  ;;  %v1662_v49 = vld [vmem:[%s3493_s8 + $0x8] sm:$0xff]  ;;  %v2011_v59 = vld [vmem:[%s3496_s11 + $0x18] sm:$0xff] }
  0xf6   : > { %798 = vxpose.xlu0.b32.start [1/4] (short) (narrow) %v794_v58, 16  ;;  %v718_v62 = vadd.f32 %v717_v61, %v525_v47  ;;  %v2395_v47 = vld [vmem:[%s3489_s4 + $0x1] ss:$0 sm:$0xff]  ;;  %v2013_v61 = vld [vmem:[%s3496_s11 + $0x28] sm:$0xff] }
  0xf7   : > { %v797_v16 = vmul.f32 0.03125, %v723_v9  ;;  %v2008_v58 = vld [vmem:[%s3496_s11] sm:$0xff] }
  0xf8   : > { %v2586_v0 = vpop.f32.mrb[4].mxu0  ;;  %v796_v3 = vmul.f32 0.03125, %v718_v62  ;;  %v2012_v62 = vld [vmem:[%s3496_s11 + $0x20] sm:$0xff] }
  0xf9   : > { %v727_v1 = vpop.f32.mrb[5].mxu0  ;;  %v733_v10 = vadd.f32 %v2586_v0, %v540_v51  ;;  %v1664_v51 = vld [vmem:[%s3493_s8 + $0x18] sm:$0xff]  ;;  %v2014_v0 = vld [vmem:[%s3496_s11 + $0x30] sm:$0xff]  ;;  %v2092_v9 = vld [vmem:[%s3498_s13 + $0x20] sm:$0xff] }
  0xfa   : > { %v728_v4 = vadd.f32 %v727_v1, %v535_v52  ;;  %799 = vxpose.xlu0.b32.cont [2/4] (short) (narrow) %v795_v63, 16  ;;  %v1663_v52 = vld [vmem:[%s3493_s8 + $0x10] sm:$0xff]  ;;  %v2015_v63 = vld [vmem:[%s3496_s11 + $0x38] sm:$0xff]  ;;  %v2089_v1 = vld [vmem:[%s3498_s13 + $0x8] sm:$0xff] }
  0xfb   : > { %v1294_v17 = vmul.f32 0.03125, %v733_v10  ;;  %v2095_v10 = vld [vmem:[%s3498_s13 + $0x38] sm:$0xff] }
  0xfc   : > { %v1293_v12 = vmul.f32 0.03125, %v728_v4  ;;  %v2589_v13 = vpop.f32.mrb[6].mxu0  ;;  %v2090_v4 = vld [vmem:[%s3498_s13 + $0x10] sm:$0xff] }
  0xfd   : > { %v737_v14 = vpop.f32.mrb[7].mxu0  ;;  %v743_v24 = vadd.f32 %v2589_v13, %v550_v2  ;;  %v2088_v2 = vld [vmem:[%s3498_s13] sm:$0xff] }
  0xfe   : > { %1297 = vxpose.xlu1.b32.start [1/4] (short) (narrow) %v1293_v12, 16  ;;  %800 = vxpose.xlu0.b32.cont [3/4] (short) (narrow) %v796_v3, 16  ;;  %v738_v18 = vadd.f32 %v737_v14, %v545_v5  ;;  %v2091_v3 = vld [vmem:[%s3498_s13 + $0x18] sm:$0xff]  ;;  %v2093_v5 = vld [vmem:[%s3498_s13 + $0x28] sm:$0xff]  ;;  %v2094_v12 = vld [vmem:[%s3498_s13 + $0x30] sm:$0xff] }
  0xff   : > { %v1296_v33 = vmul.f32 0.03125, %v743_v24 }
 0x100   : > { %v2592_v19 = vpop.f32.mrb[8].mxu0  ;;  %v1295_v25 = vmul.f32 0.03125, %v738_v18 }
 0x101   : > { %v753_v21 = vadd.f32 %v2592_v19, %v560_v56  ;;  %v747_v22 = vpop.f32.mrb[9].mxu0  ;;  %v1667_v56 = vld [vmem:[%s3493_s8 + $0x30] sm:$0xff] }
 0x102   : > { %v748_v23 = vadd.f32 %v747_v22, %v555_v60  ;;  %1298 = vxpose.xlu1.b32.cont [2/4] (short) (narrow) %v1294_v17, 16  ;;  %801 = vxpose.xlu0.b32.end [4/4] (short) (narrow) %v797_v16, 16  ;;  %v2010_v60 = vld [vmem:[%s3496_s11 + $0x10] sm:$0xff] }
 0x104   : > { %v2595_v26 = vpop.f32.mrb[10].mxu0  ;;  %v2788_v27 = vpack.c.bf16 %v753_v21, %v748_v23  ;;  %v926_v23 = vld [vmem:[%s3490_s5 + $0x8] sm:$0xff] }
 0x105   : > { %v763_v28 = vadd.f32 %v2595_v26, %v570_v15  ;;  %v757_v29 = vpop.f32.mrb[11].mxu0  ;;  %v925_v26 = vld [vmem:[%s3490_s5] sm:$0xff] }
 0x106   : > { %v758_v31 = vadd.f32 %v757_v29, %v565_v20  ;;  %2789 = vmatprep.subr.bf16.mxu1 %v2788_v27  ;;  %1299 = vxpose.xlu1.b32.cont [3/4] (short) (narrow) %v1295_v25, 16 }
 0x107   : > { %2791 = vmatpush3.bf16.msra.mxu1 %v2788_v27 }
 0x108   : > { %v2792_v34 = vpack.c.bf16 %v763_v28, %v758_v31  ;;  %v2598_v35 = vpop.f32.mrb[12].mxu0 }
 0x109   : > { %v773_v36 = vadd.f32 %v2598_v35, %v580_v30  ;;  %v767_v37 = vpop.f32.mrb[13].mxu0 }
 0x10a   : > { %v768_v38 = vadd.f32 %v767_v37, %v575_v32  ;;  %2793 = vmatprep.subr.bf16.mxu1 %v2792_v34  ;;  %1300 = vxpose.xlu1.b32.end [4/4] (short) (narrow) %v1296_v33, 16  ;;  %v2397_v33 = vld [vmem:[%s3490_s5 + $0x18] sm:$0xff] }
 0x10b   : > { %2795 = vmatpush3.bf16.msra.mxu1 %v2792_v34 }
 0x10c   : > { %v2816_v40 = vpack.c.bf16 %v773_v36, %v768_v38  ;;  %v2601_v41 = vpop.f32.mrb[14].mxu0  ;;  %v2396_v36 = vld [vmem:[%s3490_s5 + $0x10] sm:$0xff] }
 0x10d   : > { %v783_v43 = vadd.f32 %v2601_v41, %v590_v39  ;;  %v777_v44 = vpop.f32.mrb[15].mxu0  ;;  %v1027_v41 = vld [vmem:[%s3491_s6] sm:$0xff] }
 0x10e   : > { %v778_v45 = vadd.f32 %v777_v44, %v585_v42  ;;  %2817 = vmatprep.subr.bf16.mxu0 %v2816_v40  ;;  %v2808_v42 = vpack.c.bf16 %v3036_v7, %v3034_v6 }
 0x10f   : > { %2819 = vmatpush3.bf16.msra.mxu0 %v2816_v40 }
 0x110   : > { %v2820_v46 = vpack.c.bf16 %v783_v43, %v778_v45  ;;  %v2812_v43 = vpack.c.bf16 %v3042_v11, %v3038_v8 }
 0x112   : > { %2821 = vmatprep.subr.bf16.mxu0 %v2820_v46 }
 0x113   : > { %2823 = vmatpush3.bf16.msra.mxu0 %v2820_v46 }
 0x128   : > { %1420 = vperm.xlu1 %2911, %v2395_v47  }
 0x12b   : > { %920 = vperm.xlu0 %2910, %v2371_v48  }
 0x12c   : > { %1676 = vperm.xlu1 %2911, %v1662_v49  }
 0x12f   : > { %1671 = vperm.xlu0 %2910, %v1661_v50  }
 0x130   : > { %1686 = vperm.xlu1 %2911, %v1664_v51  }
 0x133   : > { %1681 = vperm.xlu0 %2910, %v1663_v52   ;;  %v1030_v52 = vld [vmem:[%s3491_s6 + $0x18] sm:$0xff] }
 0x134   : > { %1696 = vperm.xlu1 %2911, %v1666_v53  }
 0x137   : > { %1691 = vperm.xlu0 %2910, %v1665_v54   ;;  %v1031_v54 = vld [vmem:[%s3491_s6 + $0x20] sm:$0xff] }
 0x138   : > { %1706 = vperm.xlu1 %2911, %v1668_v55  }
 0x13b   : > { %1701 = vperm.xlu0 %2910, %v1667_v56   ;;  %v1032_v56 = vld [vmem:[%s3491_s6 + $0x28] sm:$0xff] }
 0x13c   : > { %2023 = vperm.xlu1 %2911, %v2009_v57   ;;  %v1033_v57 = vld [vmem:[%s3491_s6 + $0x30] sm:$0xff] }
 0x13f   : > { %2018 = vperm.xlu0 %2910, %v2008_v58   ;;  %v1034_v58 = vld [vmem:[%s3491_s6 + $0x38] sm:$0xff] }
 0x140   : > { %2033 = vperm.xlu1 %2911, %v2011_v59   ;;  %v786_v59 = vld [vmem:[%s3492_s7] sm:$0xff] }
 0x143   : > { %2028 = vperm.xlu0 %2910, %v2010_v60   ;;  %v787_v60 = vld [vmem:[%s3492_s7 + $0x8] sm:$0xff] }
 0x144   : > { %2043 = vperm.xlu1 %2911, %v2013_v61   ;;  %v788_v61 = vld [vmem:[%s3492_s7 + $0x10] sm:$0xff] }
 0x147   : > { %2038 = vperm.xlu0 %2910, %v2012_v62   ;;  %v789_v62 = vld [vmem:[%s3492_s7 + $0x18] sm:$0xff] }
 0x148   : > { %2053 = vperm.xlu1 %2911, %v2015_v63   ;;  %v790_v63 = vld [vmem:[%s3492_s7 + $0x20] sm:$0xff] }
 0x14b   : > { %2048 = vperm.xlu0 %2910, %v2014_v0   ;;  %v791_v0 = vld [vmem:[%s3492_s7 + $0x28] sm:$0xff] }
 0x14c   : > { %2103 = vperm.xlu1 %2911, %v2089_v1   ;;  %v792_v1 = vld [vmem:[%s3492_s7 + $0x30] sm:$0xff] }
 0x14f   : > { %2098 = vperm.xlu0 %2910, %v2088_v2   ;;  %v793_v2 = vld [vmem:[%s3492_s7 + $0x38] sm:$0xff] }
 0x150   : > { %2113 = vperm.xlu1 %2911, %v2091_v3   ;;  %v2402_v3 = vld [vmem:[%s3491_s6 + $0x40] sm:$0xff] }
 0x153   : > { %2108 = vperm.xlu0 %2910, %v2090_v4   ;;  %v2403_v4 = vld [vmem:[%s3491_s6 + $0x48] sm:$0xff] }
 0x154   : > { %2123 = vperm.xlu1 %2911, %v2093_v5   ;;  %v2404_v5 = vld [vmem:[%s3491_s6 + $0x50] sm:$0xff] }
 0x157   : > { %2118 = vperm.xlu0 %2910, %v2092_v9   ;;  %v2405_v9 = vld [vmem:[%s3491_s6 + $0x58] sm:$0xff] }
 0x158   : > { %2133 = vperm.xlu1 %2911, %v2095_v10   ;;  %v2406_v10 = vld [vmem:[%s3491_s6 + $0x60] sm:$0xff] }
 0x15b   : > { %2128 = vperm.xlu0 %2910, %v2094_v12   ;;  %v2407_v12 = vld [vmem:[%s3491_s6 + $0x68] sm:$0xff] }
 0x176   : > { %v814_v13 = vpop.trf.xlu0 }
 0x177   : > { %2610 = vmatprep.mubr.msk.f32.mxu1 %vm592_vm0, %v814_v13  ;;  %v2408_v13 = vld [vmem:[%s3491_s6 + $0x70] sm:$0xff] }
 0x17a   : > { %v815_v14 = vpop.trf.xlu0 }
 0x17b   : > { %2611 = vmatmul.mubr.msk.f32.vlgmr.msra.gmra.mrb[0].mxu1 %vm592_vm0, %v815_v14  ;;  %v2409_v14 = vld [vmem:[%s3491_s6 + $0x78] sm:$0xff] }
 0x17c   : > { %2617 = vmatprep.mubr.msk.f32.mxu1 %vm929_vm1, %v3034_v6 }
 0x17e   : > { %v1313_v15 = vpop.trf.xlu1 }
 0x17f   : > { %2671 = vmatprep.mubr.msk.f32.mxu0 %vm592_vm0, %v1313_v15  ;;  %v1741_v15 = vld [vmem:[%s3495_s10] sm:$0xff] }
 0x182   : > { %v1314_v16 = vpop.trf.xlu1 }
 0x183   : > { %2672 = vmatmul.mubr.msk.f32.vlgmr.msra.gmra.mrb[16].mxu0 %vm592_vm0, %v1314_v16  ;;  %v1742_v16 = vld [vmem:[%s3495_s10 + $0x8] sm:$0xff] }
 0x184   : > { %2678 = vmatprep.mubr.msk.f32.mxu0 %vm929_vm1, %v3034_v6  ;;  %v1028_v6 = vld [vmem:[%s3491_s6 + $0x8] sm:$0xff] }
 0x1a7   : > { %v1421_v32 = vpop.permute.xlu1 %1420 }
 0x1aa   : > { %v921_v22 = vpop.permute.xlu0 %920 }
 0x24e   : > { %v2612_v17 = vpop.f32.mrb[0].mxu1 }
 0x24f   : > { %2912 = vtanh.f32 %v2612_v17  ;;  %v902_v18 = vpop.f32.mrb[1].mxu1  ;;  %v1743_v17 = vld [vmem:[%s3495_s10 + $0x10] sm:$0xff] }
 0x250   : > { %2914 = vtanh.f32 %v902_v18  ;;  %v1744_v18 = vld [vmem:[%s3495_s10 + $0x18] sm:$0xff] }
 0x256   : > { %v2673_v19 = vpop.f32.mrb[16].mxu0 }
 0x257   : > { %2916 = vtanh.f32 %v2673_v19  ;;  %v1401_v20 = vpop.f32.mrb[17].mxu0  ;;  %v1745_v19 = vld [vmem:[%s3495_s10 + $0x20] sm:$0xff] }
 0x258   : > { %2918 = vtanh.f32 %v1401_v20  ;;  %v1746_v20 = vld [vmem:[%s3495_s10 + $0x28] sm:$0xff] }
 0x259   : > { %v2913_v21 = vpop.eup %2912 }
 0x25a   : > { %v2915_v24 = vpop.eup %2914  ;;  %v924_v25 = vmul.f32 %v2913_v21, %v921_v22  ;;  %v1747_v21 = vld [vmem:[%s3495_s10 + $0x30] sm:$0xff] }
 0x25b   : > { %v923_v27 = vmul.f32 %v2915_v24, %v921_v22  ;;  %v1748_v22 = vld [vmem:[%s3495_s10 + $0x38] sm:$0xff]  ;;  %v1677_v24 = vpop.permute.xlu1 %1676 }
 0x25c   : > { %v928_v28 = vadd.f32 %v926_v23, %v924_v25  ;;  %v1733_v23 = vld [vmem:[%s3494_s9] sm:$0xff]  ;;  %v1672_v25 = vpop.permute.xlu0 %1671 }
 0x25d   : > { %v927_v29 = vadd.f32 %v925_v26, %v923_v27 }
 0x25f   : > { %v2796_v30 = vpack.c.bf16 %v928_v28, %v927_v29  ;;  %v1687_v26 = vpop.permute.xlu1 %1686 }
 0x260   : > { %v1682_v28 = vpop.permute.xlu0 %1681 }
 0x261   : > { %v2917_v31 = vpop.eup %2916  ;;  %2797 = vmatprep.subr.bf16.mxu1 %v2796_v30 }
 0x262   : > { %v2919_v34 = vpop.eup %2918  ;;  %2799 = vmatpush3.bf16.msra.mxu1 %v2796_v30  ;;  %v1424_v35 = vmul.f32 %v2917_v31, %v1421_v32 }
 0x263   : > { %v1423_v37 = vmul.f32 %v2919_v34, %v1421_v32 }
 0x264   : > { %v1429_v38 = vadd.f32 %v2397_v33, %v1424_v35 }
 0x265   : > { %2618 = vmatmul.mubr.msk.f32.vlgmr.msra.gmra.mrb[2].mxu1 %vm929_vm1, %v3036_v7  ;;  %v1428_v39 = vadd.f32 %v2396_v36, %v1423_v37 }
 0x266   : > { %2620 = vmatprep.mubr.msk.f32.mxu1 %vm929_vm1, %v3038_v8 }
 0x267   : > { %v2824_v40 = vpack.c.bf16 %v1429_v38, %v1428_v39  ;;  %v1697_v38 = vpop.permute.xlu1 %1696 }
 0x269   : > { %2621 = vmatmul.mubr.msk.f32.gmra.mrb[4].mxu1 %vm929_vm1, %v3042_v11  ;;  %2825 = vmatprep.subr.bf16.mxu0 %v2824_v40 }
 0x26a   : > { %2827 = vmatpush3.bf16.msra.mxu0 %v2824_v40  ;;  %2631 = vmatprep.mubr.msk.f32.mxu1 %vm592_vm0, %v1027_v41  ;;  %v1692_v41 = vpop.permute.xlu0 %1691 }
 0x26b   : > { %2837 = vmatprep.subr.bf16.mxu0 %v2808_v42 }
 0x26d   : > { %2679 = vmatmul.mubr.msk.f32.vlgmr.msra.gmra.mrb[18].mxu0 %vm929_vm1, %v3036_v7 }
 0x26e   : > { %2681 = vmatprep.mubr.msk.f32.mxu0 %vm929_vm1, %v3038_v8  ;;  %2839 = vmatpush3.bf16.msra.mxu0 %v2808_v42  ;;  %v1029_v8 = vld [vmem:[%s3491_s6 + $0x10] sm:$0xff] }
 0x26f   : > { %2841 = vmatprep.subr.bf16.mxu0 %v2812_v43 }
 0x271   : > { %2682 = vmatmul.mubr.msk.f32.gmra.mrb[20].mxu0 %vm929_vm1, %v3042_v11 }
 0x272   : > { %2843 = vmatpush3.bf16.msra.mxu0 %v2812_v43  ;;  %2712 = vmatprep.mubr.msk.f32.mxu0 %vm592_vm0, %v1741_v15 }
 0x275   : > { %2713 = vmatmul.mubr.msk.f32.vlgmr.msra.gmra.mrb[22].mxu0 %vm592_vm0, %v1742_v16 }
 0x276   : > { %2715 = vmatprep.mubr.msk.f32.mxu0 %vm592_vm0, %v1743_v17 }
 0x279   : > { %2716 = vmatmul.mubr.msk.f32.gmra.mrb[24].mxu0 %vm592_vm0, %v1744_v18 }
 0x27a   : > { %2718 = vmatprep.mubr.msk.f32.mxu0 %vm592_vm0, %v1745_v19 }
 0x27d   : > { %2719 = vmatmul.mubr.msk.f32.gmra.mrb[26].mxu0 %vm592_vm0, %v1746_v20 }
 0x27e   : > { %2721 = vmatprep.mubr.msk.f32.mxu0 %vm592_vm0, %v1747_v21 }
 0x281   : > { %2722 = vmatmul.mubr.msk.f32.gmra.mrb[28].mxu0 %vm592_vm0, %v1748_v22 }
 0x282   : > { %2740 = vmatprep.mubr.msk.f32.mxu0 %vm1878_vm2, %v1733_v23 }
 0x338   : > { %v2619_v44 = vpop.f32.mrb[2].mxu1 }
 0x339   : > { %v1008_v45 = vpop.f32.mrb[3].mxu1 }
 0x33a   : > { %v2800_v46 = vpack.c.bf16 %v2619_v44, %v1008_v45 }
 0x33c   : > { %v2622_v47 = vpop.f32.mrb[4].mxu1  ;;  %2801 = vmatprep.subr.bf16.mxu1 %v2800_v46 }
 0x33d   : > { %v1018_v48 = vpop.f32.mrb[5].mxu1  ;;  %2803 = vmatpush3.bf16.msra.mxu1 %v2800_v46 }
 0x33e   : > { %v2804_v49 = vpack.c.bf16 %v2622_v47, %v1018_v48 }
 0x340   : > { %2805 = vmatprep.subr.bf16.mxu1 %v2804_v49  ;;  %v2680_v50 = vpop.f32.mrb[18].mxu0 }
 0x341   : > { %2807 = vmatpush3.bf16.msra.mxu1 %v2804_v49  ;;  %v1496_v7 = vpop.f32.mrb[19].mxu0 }
 0x342   : > { %2809 = vmatprep.subr.bf16.mxu1 %v2808_v42  ;;  %v2828_v11 = vpack.c.bf16 %v2680_v50, %v1496_v7  ;;  %v1707_v7 = vpop.permute.xlu1 %1706 }
 0x344   : > { %2632 = vmatmul.mubr.msk.f32.vlgmr.msra.gmra.mrb[6].mxu1 %vm592_vm0, %v1028_v6  ;;  %v2683_v51 = vpop.f32.mrb[20].mxu0 }
 0x345   : > { %2811 = vmatpush3.bf16.msra.mxu1 %v2808_v42  ;;  %2634 = vmatprep.mubr.msk.f32.mxu1 %vm592_vm0, %v1029_v8  ;;  %v1506_v53 = vpop.f32.mrb[21].mxu0 }
 0x346   : > { %2813 = vmatprep.subr.bf16.mxu1 %v2812_v43  ;;  %v2832_v55 = vpack.c.bf16 %v2683_v51, %v1506_v53 }
 0x348   : > { %2635 = vmatmul.mubr.msk.f32.gmra.mrb[8].mxu1 %vm592_vm0, %v1030_v52  ;;  %v1702_v52 = vpop.permute.xlu0 %1701 }
 0x349   : > { %2637 = vmatprep.mubr.msk.f32.mxu1 %vm592_vm0, %v1031_v54  ;;  %2815 = vmatpush3.bf16.msra.mxu1 %v2812_v43 }
 0x34a   : > { %2829 = vmatprep.subr.bf16.mxu1 %v2828_v11 }
 0x34c   : > { %2638 = vmatmul.mubr.msk.f32.gmra.mrb[10].mxu1 %vm592_vm0, %v1032_v56 }
 0x34d   : > { %2640 = vmatprep.mubr.msk.f32.mxu1 %vm592_vm0, %v1033_v57 }
 0x350   : > { %2641 = vmatmul.mubr.msk.f32.gmra.mrb[12].mxu1 %vm592_vm0, %v1034_v58 }
 0x351   : > { %2651 = vmatprep.mubr.msk.f32.mxu1 %vm592_vm0, %v786_v59 }
 0x354   : > { %2652 = vmatmul.mubr.msk.f32.vlgmr.msra.gmra.mrb[6].mxu1 %vm592_vm0, %v787_v60 }
 0x355   : > { %2831 = vmatpush3.bf16.msra.mxu1 %v2828_v11  ;;  %2654 = vmatprep.mubr.msk.f32.mxu1 %vm592_vm0, %v788_v61 }
 0x356   : > { %2833 = vmatprep.subr.bf16.mxu1 %v2832_v55 }
 0x358   : > { %2655 = vmatmul.mubr.msk.f32.gmra.mrb[8].mxu1 %vm592_vm0, %v789_v62 }
 0x359   : > { %2657 = vmatprep.mubr.msk.f32.mxu1 %vm592_vm0, %v790_v63  ;;  %2835 = vmatpush3.bf16.msra.mxu1 %v2832_v55 }
 0x35c   : > { %2658 = vmatmul.mubr.msk.f32.gmra.mrb[10].mxu1 %vm592_vm0, %v791_v0  ;;  %v1734_v0 = vld [vmem:[%s3494_s9 + $0x8] sm:$0xff] }
 0x35d   : > { %2660 = vmatprep.mubr.msk.f32.mxu1 %vm592_vm0, %v792_v1  ;;  %v1735_v1 = vld [vmem:[%s3494_s9 + $0x10] sm:$0xff] }
 0x360   : > { %2661 = vmatmul.mubr.msk.f32.gmra.mrb[12].mxu1 %vm592_vm0, %v793_v2  ;;  %v1736_v2 = vld [vmem:[%s3494_s9 + $0x18] sm:$0xff] }
 0x361   : > { %2692 = vmatprep.mubr.msk.f32.mxu1 %vm592_vm0, %v2402_v3  ;;  %v1737_v3 = vld [vmem:[%s3494_s9 + $0x20] sm:$0xff] }
 0x364   : > { %2693 = vmatmul.mubr.msk.f32.vlgmr.msra.gmra.mrb[6].mxu1 %vm592_vm0, %v2403_v4  ;;  %v1738_v4 = vld [vmem:[%s3494_s9 + $0x28] sm:$0xff] }
 0x365   : > { %2695 = vmatprep.mubr.msk.f32.mxu1 %vm592_vm0, %v2404_v5  ;;  %v1739_v5 = vld [vmem:[%s3494_s9 + $0x30] sm:$0xff] }
 0x368   : > { %2696 = vmatmul.mubr.msk.f32.gmra.mrb[8].mxu1 %vm592_vm0, %v2405_v9  ;;  %v1740_v9 = vld [vmem:[%s3494_s9 + $0x38] sm:$0xff] }
 0x369   : > { %2698 = vmatprep.mubr.msk.f32.mxu1 %vm592_vm0, %v2406_v10  ;;  %v2080_v10 = vld [vmem:[%s3497_s12] sm:$0xff] }
 0x36c   : > { %2699 = vmatmul.mubr.msk.f32.gmra.mrb[10].mxu1 %vm592_vm0, %v2407_v12  ;;  %v2024_v12 = vpop.permute.xlu1 %2023 }
 0x36d   : > { %2701 = vmatprep.mubr.msk.f32.mxu1 %vm592_vm0, %v2408_v13  ;;  %v2019_v13 = vpop.permute.xlu0 %2018 }
 0x370   : > { %2702 = vmatmul.mubr.msk.f32.gmra.mrb[12].mxu1 %vm592_vm0, %v2409_v14  ;;  %v2034_v14 = vpop.permute.xlu1 %2033 }
 0x371   : > { %2768 = vmatprep.mubr.msk.f32.mxu1 %vm1878_vm2, %v2080_v10  ;;  %v2029_v16 = vpop.permute.xlu0 %2028 }
 0x437   : > { %v2694_v27 = vpop.f32.mrb[6].mxu1 }
 0x438   : > { %v1710_v29 = vadd.f32 %v2694_v27, %v1677_v24  ;;  %v1614_v30 = vpop.f32.mrb[7].mxu1 }
 0x439   : > { %v1709_v31 = vadd.f32 %v1672_v25, %v1614_v30 }
 0x43a   : > { %v1718_v32 = vmul.f32 0.1, %v1710_v29 }
 0x43b   : > { %v1717_v33 = vmul.f32 0.1, %v1709_v31  ;;  %v2697_v34 = vpop.f32.mrb[8].mxu1 }
 0x43c   : > { %v1726_v35 = vmax.f32 %v1710_v29, %v1718_v32  ;;  %v1712_v36 = vadd.f32 %v2697_v34, %v1687_v26  ;;  %v1624_v37 = vpop.f32.mrb[9].mxu1  ;;  %v2044_v26 = vpop.permute.xlu1 %2043 }
 0x43d   : > { %v1725_v39 = vmax.f32 %v1709_v31, %v1717_v33  ;;  %v1711_v40 = vadd.f32 %v1682_v28, %v1624_v37  ;;  %v2039_v29 = vpop.permute.xlu0 %2038 }
 0x43e   : > { %v1720_v42 = vmul.f32 0.1, %v1712_v36 }
 0x43f   : > { %v1719_v43 = vmul.f32 0.1, %v1711_v40  ;;  %v2700_v44 = vpop.f32.mrb[10].mxu1  ;;  %v2844_v45 = vpack.c.bf16 %v1726_v35, %v1725_v39 }
 0x440   : > { %v1728_v46 = vmax.f32 %v1712_v36, %v1720_v42  ;;  %v1714_v47 = vadd.f32 %v2700_v44, %v1697_v38  ;;  %v1634_v48 = vpop.f32.mrb[11].mxu1 }
 0x441   : > { %v1727_v49 = vmax.f32 %v1711_v40, %v1719_v43  ;;  %v1713_v50 = vadd.f32 %v1692_v41, %v1634_v48  ;;  %2845 = vmatprep.subr.bf16.mxu0 %v2844_v45  ;;  %v2054_v40 = vpop.permute.xlu1 %2053  ;;  %v2049_v44 = vpop.permute.xlu0 %2048 }
 0x442   : > { %v1722_v6 = vmul.f32 0.1, %v1714_v47  ;;  %2847 = vmatpush3.bf16.msra.mxu0 %v2844_v45 }
 0x443   : > { %v1721_v8 = vmul.f32 0.1, %v1713_v50  ;;  %v2703_v11 = vpop.f32.mrb[12].mxu1  ;;  %v2848_v51 = vpack.c.bf16 %v1728_v46, %v1727_v49 }
 0x444   : > { %v1730_v53 = vmax.f32 %v1714_v47, %v1722_v6  ;;  %v1716_v54 = vadd.f32 %v2703_v11, %v1707_v7  ;;  %v1644_v55 = vpop.f32.mrb[13].mxu1 }
 0x445   : > { %v1729_v56 = vmax.f32 %v1713_v50, %v1721_v8  ;;  %v1715_v57 = vadd.f32 %v1702_v52, %v1644_v55  ;;  %2849 = vmatprep.subr.bf16.mxu0 %v2848_v51  ;;  %v2081_v52 = vld [vmem:[%s3497_s12 + $0x8] sm:$0xff]  ;;  %v2084_v55 = vld [vmem:[%s3497_s12 + $0x20] sm:$0xff] }
 0x446   : > { %v1724_v58 = vmul.f32 0.1, %v1716_v54  ;;  %2851 = vmatpush3.bf16.msra.mxu0 %v2848_v51 }
 0x447   : > { %v1723_v59 = vmul.f32 0.1, %v1715_v57  ;;  %v2852_v60 = vpack.c.bf16 %v1730_v53, %v1729_v56  ;;  %v2082_v53 = vld [vmem:[%s3497_s12 + $0x10] sm:$0xff]  ;;  %v2085_v56 = vld [vmem:[%s3497_s12 + $0x28] sm:$0xff] }
 0x448   : > { %v1732_v61 = vmax.f32 %v1716_v54, %v1724_v58  ;;  %v2083_v54 = vld [vmem:[%s3497_s12 + $0x18] sm:$0xff] }
 0x449   : > { %v1731_v62 = vmax.f32 %v1715_v57, %v1723_v59  ;;  %2853 = vmatprep.subr.bf16.mxu0 %v2852_v60  ;;  %v2086_v57 = vld [vmem:[%s3497_s12 + $0x30] sm:$0xff]  ;;  %v2087_v58 = vld [vmem:[%s3497_s12 + $0x38] sm:$0xff]  ;;  %v2104_v59 = vpop.permute.xlu1 %2103 }
 0x44a   : > { %2855 = vmatpush3.bf16.msra.mxu0 %v2852_v60  ;;  %v2099_v60 = vpop.permute.xlu0 %2098 }
 0x44b   : > { %v2856_v63 = vpack.c.bf16 %v1732_v61, %v1731_v62 }
 0x44d   : > { %2857 = vmatprep.subr.bf16.mxu0 %v2856_v63  ;;  %v2114_v61 = vpop.permute.xlu1 %2113 }
 0x44e   : > { %2859 = vmatpush3.bf16.msra.mxu0 %v2856_v63  ;;  %v2109_v63 = vpop.permute.xlu0 %2108 }
 0x451   : > { %2741 = vmatmul.mubr.msk.f32.vlgmr.msra.gmra.mrb[22].mxu0 %vm1878_vm2, %v1734_v0 }
 0x452   : > { %2743 = vmatprep.mubr.msk.f32.mxu0 %vm1878_vm2, %v1735_v1 }
 0x455   : > { %2744 = vmatmul.mubr.msk.f32.gmra.mrb[24].mxu0 %vm1878_vm2, %v1736_v2 }
 0x456   : > { %2746 = vmatprep.mubr.msk.f32.mxu0 %vm1878_vm2, %v1737_v3 }
 0x459   : > { %2747 = vmatmul.mubr.msk.f32.gmra.mrb[26].mxu0 %vm1878_vm2, %v1738_v4 }
 0x45a   : > { %2749 = vmatprep.mubr.msk.f32.mxu0 %vm1878_vm2, %v1739_v5 }
 0x45d   : > { %2750 = vmatmul.mubr.msk.f32.gmra.mrb[28].mxu0 %vm1878_vm2, %v1740_v9 }
 0x524   : > { %v2742_v15 = vpop.f32.mrb[22].mxu0 }
 0x525   : > { %v2057_v17 = vadd.f32 %v2742_v15, %v2024_v12  ;;  %v1969_v18 = vpop.f32.mrb[23].mxu0 }
 0x526   : > { %v2056_v19 = vadd.f32 %v2019_v13, %v1969_v18  ;;  %v2124_v13 = vpop.permute.xlu1 %2123 }
 0x527   : > { %v2065_v20 = vmul.f32 0.1, %v2057_v17 }
 0x528   : > { %v2064_v21 = vmul.f32 0.1, %v2056_v19  ;;  %v2745_v22 = vpop.f32.mrb[24].mxu0 }
 0x529   : > { %v2073_v23 = vmax.f32 %v2057_v17, %v2065_v20  ;;  %v2059_v24 = vadd.f32 %v2745_v22, %v2034_v14  ;;  %v1979_v25 = vpop.f32.mrb[25].mxu0 }
 0x52a   : > { %v2072_v27 = vmax.f32 %v2056_v19, %v2064_v21  ;;  %v2058_v28 = vadd.f32 %v2029_v16, %v1979_v25  ;;  %v2119_v16 = vpop.permute.xlu0 %2118 }
 0x52b   : > { %v2067_v30 = vmul.f32 0.1, %v2059_v24 }
 0x52c   : > { %v2066_v31 = vmul.f32 0.1, %v2058_v28  ;;  %v2748_v32 = vpop.f32.mrb[26].mxu0  ;;  %v2860_v33 = vpack.c.bf16 %v2073_v23, %v2072_v27 }
 0x52d   : > { %v2075_v34 = vmax.f32 %v2059_v24, %v2067_v30  ;;  %v2061_v35 = vadd.f32 %v2748_v32, %v2044_v26  ;;  %v1989_v36 = vpop.f32.mrb[27].mxu0  ;;  %v2134_v26 = vpop.permute.xlu1 %2133 }
 0x52e   : > { %v2074_v37 = vmax.f32 %v2058_v28, %v2066_v31  ;;  %v2060_v38 = vadd.f32 %v2039_v29, %v1989_v36  ;;  %2861 = vmatprep.subr.bf16.mxu1 %v2860_v33  ;;  %v2129_v29 = vpop.permute.xlu0 %2128 }
 0x52f   : > { %v2069_v39 = vmul.f32 0.1, %v2061_v35  ;;  %2863 = vmatpush3.bf16.msra.mxu1 %v2860_v33 }
 0x530   : > { %v2068_v41 = vmul.f32 0.1, %v2060_v38  ;;  %v2751_v42 = vpop.f32.mrb[28].mxu0  ;;  %v2864_v43 = vpack.c.bf16 %v2075_v34, %v2074_v37 }
 0x531   : > { %v2077_v45 = vmax.f32 %v2061_v35, %v2069_v39  ;;  %v2063_v46 = vadd.f32 %v2751_v42, %v2054_v40  ;;  %v1999_v47 = vpop.f32.mrb[29].mxu0 }
 0x532   : > { %v2076_v48 = vmax.f32 %v2060_v38, %v2068_v41  ;;  %v2062_v49 = vadd.f32 %v2049_v44, %v1999_v47  ;;  %2865 = vmatprep.subr.bf16.mxu1 %v2864_v43 }
 0x533   : > { %v2071_v50 = vmul.f32 0.1, %v2063_v46  ;;  %2867 = vmatpush3.bf16.msra.mxu1 %v2864_v43 }
 0x534   : > { %v2070_v6 = vmul.f32 0.1, %v2062_v49  ;;  %v2868_v7 = vpack.c.bf16 %v2077_v45, %v2076_v48 }
 0x535   : > { %v2079_v8 = vmax.f32 %v2063_v46, %v2071_v50 }
 0x536   : > { %v2078_v11 = vmax.f32 %v2062_v49, %v2070_v6  ;;  %2869 = vmatprep.subr.bf16.mxu1 %v2868_v7 }
 0x537   : > { %2871 = vmatpush3.bf16.msra.mxu1 %v2868_v7 }
 0x538   : > { %v2872_v51 = vpack.c.bf16 %v2079_v8, %v2078_v11 }
 0x53a   : > { %2873 = vmatprep.subr.bf16.mxu1 %v2872_v51 }
 0x53b   : > { %2875 = vmatpush3.bf16.msra.mxu1 %v2872_v51 }
 0x53e   : > { %2769 = vmatmul.mubr.msk.f32.vlgmr.msra.gmra.mrb[14].mxu1 %vm1878_vm2, %v2081_v52 }
 0x53f   : > { %2771 = vmatprep.mubr.msk.f32.mxu1 %vm1878_vm2, %v2082_v53 }
 0x542   : > { %2772 = vmatmul.mubr.msk.f32.gmra.mrb[16].mxu1 %vm1878_vm2, %v2083_v54 }
 0x543   : > { %2774 = vmatprep.mubr.msk.f32.mxu1 %vm1878_vm2, %v2084_v55 }
 0x546   : > { %2775 = vmatmul.mubr.msk.f32.gmra.mrb[18].mxu1 %vm1878_vm2, %v2085_v56 }
 0x547   : > { %2777 = vmatprep.mubr.msk.f32.mxu1 %vm1878_vm2, %v2086_v57 }
 0x54a   : > { %2778 = vmatmul.mubr.msk.f32.gmra.mrb[20].mxu1 %vm1878_vm2, %v2087_v58 }
 0x611   : > { %v2770_v62 = vpop.f32.mrb[14].mxu1 }
 0x612   : > { %v2232_v0 = vadd.f32 %v2770_v62, %v2104_v59  ;;  %v2226_v1 = vpop.f32.mrb[15].mxu1 }
 0x613   : > { %v2227_v2 = vadd.f32 %v2226_v1, %v2099_v60 }
 0x614   : > { %v2266_v3 = vmul.f32 0.1, %v2232_v0 }
 0x615   : > { %v2265_v4 = vmul.f32 0.1, %v2227_v2  ;;  %v2773_v5 = vpop.f32.mrb[16].mxu1 }
 0x616   : > { %v2274_v9 = vmax.f32 %v2232_v0, %v2266_v3  ;;  %v2242_v10 = vadd.f32 %v2773_v5, %v2114_v61  ;;  %v2236_v12 = vpop.f32.mrb[17].mxu1 }
 0x617   : > { %v2273_v14 = vmax.f32 %v2227_v2, %v2265_v4  ;;  %v2237_v15 = vadd.f32 %v2236_v12, %v2109_v63 }
 0x618   : > { %2282 = vst.msk [vmem:[%s3464_s26 + $0x8] sm:$0xff] %vm929_vm1, %v2274_v9  ;;  %v2268_v17 = vmul.f32 0.1, %v2242_v10 }
 0x619   : > { %2281 = vst.msk [vmem:[%s3464_s26] sm:$0xff] %vm929_vm1, %v2273_v14  ;;  %v2267_v18 = vmul.f32 0.1, %v2237_v15  ;;  %v2776_v19 = vpop.f32.mrb[18].mxu1 }
 0x61a   : > { %v2276_v20 = vmax.f32 %v2242_v10, %v2268_v17  ;;  %v2252_v21 = vadd.f32 %v2776_v19, %v2124_v13  ;;  %v2246_v22 = vpop.f32.mrb[19].mxu1 }
 0x61b   : > { %v2275_v23 = vmax.f32 %v2237_v15, %v2267_v18  ;;  %v2247_v24 = vadd.f32 %v2246_v22, %v2119_v16 }
 0x61c   : > { %2284 = vst.msk [vmem:[%s3464_s26 + $0x18] sm:$0xff] %vm929_vm1, %v2276_v20  ;;  %v2270_v25 = vmul.f32 0.1, %v2252_v21 }
 0x61d   : > { %2283 = vst.msk [vmem:[%s3464_s26 + $0x10] sm:$0xff] %vm929_vm1, %v2275_v23  ;;  %v2269_v27 = vmul.f32 0.1, %v2247_v24  ;;  %v2779_v28 = vpop.f32.mrb[20].mxu1 }
 0x61e   : > { %v2278_v30 = vmax.f32 %v2252_v21, %v2270_v25  ;;  %v2262_v31 = vadd.f32 %v2779_v28, %v2134_v26  ;;  %v2256_v32 = vpop.f32.mrb[21].mxu1 }
 0x61f   : > { %v2277_v33 = vmax.f32 %v2247_v24, %v2269_v27  ;;  %v2257_v34 = vadd.f32 %v2256_v32, %v2129_v29 }
 0x620   : > { %2286 = vst.msk [vmem:[%s3464_s26 + $0x28] sm:$0xff] %vm929_vm1, %v2278_v30  ;;  %v2272_v35 = vmul.f32 0.1, %v2262_v31 }
 0x621   : > { %2285 = vst.msk [vmem:[%s3464_s26 + $0x20] sm:$0xff] %vm929_vm1, %v2277_v33  ;;  %v2271_v36 = vmul.f32 0.1, %v2257_v34 }
 0x622   : > { %v2280_v37 = vmax.f32 %v2262_v31, %v2272_v35 }
 0x623   : > { %v2279_v38 = vmax.f32 %v2257_v34, %v2271_v36 }
 0x624   : > { %2288 = vst.msk [vmem:[%s3464_s26 + $0x38] sm:$0xff] %vm929_vm1, %v2280_v37 }
 0x625   : > { %2287 = vst.msk [vmem:[%s3464_s26 + $0x30] sm:$0xff] %vm929_vm1, %v2279_v38 }
 0x626 PF: > { %s24_s29 = sadd.s32 1, %s2926_s29  }
 0x627   : > { %p21_p4 = scmp.ge.s32.totalorder %s24_s29, 4  }
 0x629   :  { %23 = sbr.rel (!%p21_p4) target bundleno = 1 (0x1), region = 109 }

</bundles_post_ra>
